<compile_context>
chip_gen: v7x
topology: tpu7x:2x2x1
jax: 0.10.0
libtpu: 0.0.40
codegen_flags: <defaults>
</compile_context>

<pallas_src>
import math

import jax
import jax.numpy as jnp
from jax.experimental import pallas as pl
from jax.experimental.pallas import tpu as pltpu


def _round8(n):
    return ((n + 7) // 8) * 8


# ----------------------------------------------------------------------------
# Host-side parameter packing: pre-transpose, fold biases, fuse emb @ W_ih^T,
# fold to_latent into the decoder-input / metadata heads, lane-place the
# combined output head, and concatenate everything into one f32 slab
# (row offsets 8-aligned, 128 lanes wide).
# ----------------------------------------------------------------------------
def _pack_params(params):
    f32 = jnp.float32
    emb     = params["emb"].astype(f32)                                  # (V, E)
    enc_wih = params["enc_wih"].astype(f32)                              # (R, E)
    enc_whh = params["enc_whh"].astype(f32)                              # (R, R)
    enc_b   = (params["enc_bih"] + params["enc_bhh"]).astype(f32)        # (R,)
    lat_w   = params["lat_w"].astype(f32)                                # (L, R)
    lat_b   = params["lat_b"].astype(f32)                                # (L,)
    dec_wih = params["dec_wih"].astype(f32)                              # (R, L)
    dec_whh = params["dec_whh"].astype(f32)                              # (R, R)
    dec_b0  = (params["dec_bih"] + params["dec_bhh"]).astype(f32)        # (R,)
    out_w   = params["out_w"].astype(f32)                                # (V, R)
    out_b   = params["out_b"].astype(f32)                                # (V,)
    meta_w  = params["meta_w"].astype(f32)                               # (M, L)
    meta_b  = params["meta_b"].astype(f32)                               # (M,)

    V = emb.shape[0]
    R = enc_whh.shape[0]
    L = lat_w.shape[0]
    M = meta_w.shape[0]
    C = 128                       # lane width of the slab and the output head
    assert V + M <= C and R <= C and V <= C

    # Exact host-side linear folds.
    embproj = emb @ enc_wih.T                         # (V, R)  onehot @ this
    dec_w   = lat_w.T @ dec_wih.T                     # (R, R)  h @ this
    dec_b   = lat_b @ dec_wih.T + dec_b0              # (R,)
    meta_wf = lat_w.T @ meta_w.T                      # (R, M)  h @ this
    meta_bf = lat_b @ meta_w.T + meta_b               # (M,)

    # Combined lane-placed output head: logits -> lanes [0:V), meta -> [V:V+M).
    head_out  = jnp.zeros((R, C), f32).at[:, :V].set(out_w.T)
    head_meta = jnp.zeros((R, C), f32).at[:, V:V + M].set(meta_wf)
    head_b    = (jnp.zeros((1, C), f32)
                 .at[0, :V].set(out_b)
                 .at[0, V:V + M].set(meta_bf))

    blocks = {
        "embproj":   embproj,                 # (V, R)
        "enc_whh":   enc_whh.T,               # (R, R)
        "enc_b":     enc_b.reshape(1, R),     # (1, R)
        "dec_w":     dec_w,                   # (R, R)
        "dec_b":     dec_b.reshape(1, R),     # (1, R)
        "dec_whh":   dec_whh.T,               # (R, R)
        "head_out":  head_out,                # (R, C)
        "head_meta": head_meta,               # (R, C)
        "head_b":    head_b,                  # (1, C)
    }

    offs, padded, off = {}, [], 0
    for name, arr in blocks.items():
        r, c = arr.shape
        rp = _round8(r)                        # 8-aligned row offsets
        offs[name] = off
        padded.append(jnp.pad(arr, ((0, rp - r), (0, C - c))))
        off += rp
    packed = jnp.concatenate(padded, axis=0)   # (total_rows, 128) f32
    return packed, offs, dict(V=V, R=R, L=L, M=M, C=C)


# ----------------------------------------------------------------------------
# Pallas kernel: one grid step handles one 8-row batch tile.  The packed
# weight slab is VMEM-resident across the whole grid (constant index_map).
# ----------------------------------------------------------------------------
def _make_kernel(S, V, R, C, offs):
    def kernel(oh_ref, w_ref, out_ref, h2_carry, h2_acc):
        # Decoder recurrence runs over the *batch* axis (PyTorch batch_first
        # quirk), so its hidden state is carried across batch tiles.
        @pl.when(pl.program_id(0) == 0)
        def _():
            h2_carry[...] = jnp.zeros_like(h2_carry)

        def wblk(name, rows, cols):            # static-offset slab slices
            o = offs[name]
            return w_ref[o:o + rows, :cols]

        # ---- fused embedding + encoder input projection + bias (hoisted) ----
        onehot = oh_ref[...]                                         # (S*8, V)
        xproj = (jnp.dot(onehot, wblk("embproj", V, R),
                         preferred_element_type=jnp.float32)
                 + wblk("enc_b", 1, R))                              # (S*8, R)

        # ---- encoder RNN: only h @ W_hh remains in the loop ------------------
        enc_whh = wblk("enc_whh", R, R)
        h = jnp.zeros((8, R), jnp.float32)
        for t in range(S):                         # static unroll, aligned views
            h = jnp.tanh(
                xproj[t * 8:(t + 1) * 8, :]
                + jnp.dot(h, enc_whh, preferred_element_type=jnp.float32))

        # ---- folded to_latent + decoder input projection (hoisted) -----------
        dec_in = (jnp.dot(h, wblk("dec_w", R, R),
                          preferred_element_type=jnp.float32)
                  + wblk("dec_b", 1, R))                             # (8, R)

        # ---- decoder RNN over batch rows (sequential, carried across tiles) --
        dec_whh = wblk("dec_whh", R, R)
        h2 = h2_carry[...]                                           # (1, R)
        for b in range(8):                          # static unroll
            h2 = jnp.tanh(
                dec_in[b:b + 1, :]
                + jnp.dot(h2, dec_whh, preferred_element_type=jnp.float32))
            h2_acc[b:b + 1, :] = h2
        h2_carry[...] = h2

        # ---- combined lane-dense output head: one aligned (8, 128) store -----
        # logits (from decoder rows) in lanes [0:V), metadata (from encoder
        # hidden, latent folded in) in lanes [V:V+M), zeros elsewhere.
        out_ref[...] = (
            jnp.dot(h2_acc[...], wblk("head_out", R, C),
                    preferred_element_type=jnp.float32)
            + jnp.dot(h, wblk("head_meta", R, C),
                      preferred_element_type=jnp.float32)
            + wblk("head_b", 1, C))

    return kernel


# ----------------------------------------------------------------------------
# Wrapper: layout plumbing (padding / one-hot) in XLA, batch-tile grid,
# lane-dense slab -> (B, V, S) reconstruction + (B, M) metadata.
# ----------------------------------------------------------------------------
def char_autoencoder_forward(x, params):
    B, S = x.shape
    packed, offs, dims = _pack_params(params)
    V, R, M, C = dims["V"], dims["R"], dims["M"], dims["C"]

    T = -(-B // 8)                 # batch tiles of 8 sublanes
    Bp = T * 8

    # Layout plumbing done by XLA (free relative to the kernel):
    # pad batch to a multiple of 8 (dummy index 0) and build the time-major
    # one-hot, laid out so tile i, time t occupies rows [t*8:(t+1)*8).
    x_pad = jnp.pad(x.astype(jnp.int32), ((0, Bp - B), (0, 0)))       # (Bp, S)
    oh = jax.nn.one_hot(x_pad.T, V, dtype=jnp.float32)                # (S, Bp, V)
    oh = oh.reshape(S, T, 8, V).transpose(1, 0, 2, 3).reshape(T, S * 8, V)

    kernel = _make_kernel(S, V, R, C, offs)

    out = pl.pallas_call(
        kernel,
        out_shape=jax.ShapeDtypeStruct((Bp, C), jnp.float32),
        grid_spec=pltpu.PrefetchScalarGridSpec(
            num_scalar_prefetch=0,
            grid=(T,),
            in_specs=[
                # per-tile one-hot block
                pl.BlockSpec((pl.Squeezed(), S * 8, V), lambda i: (i, 0, 0)),
                # packed weight slab: constant index_map -> DMA'd once, resident
                pl.BlockSpec(packed.shape, lambda i: (0, 0)),
            ],
            out_specs=pl.BlockSpec((8, C), lambda i: (i, 0)),
            scratch_shapes=[
                pltpu.VMEM((1, R), jnp.float32),   # decoder hidden carry
                pltpu.VMEM((8, R), jnp.float32),   # per-tile decoder rows
            ],
        ),
        # Decoder carry makes the batch-tile axis a true recurrence, so it must
        # stay "arbitrary" (sequential); it cannot be parallelised across cores.
        compiler_params=pltpu.CompilerParams(
            dimension_semantics=("arbitrary",)),
    )(oh, packed)

    logits = out[:B, :V]                               # (B, V)
    meta = out[:B, V:V + M]                            # (B, M)
    # reconstructed[b, v, s] = logits[b, v]; constant along s (decoder
    # batch_first quirk) — pure layout, done outside the kernel.
    recon = jnp.broadcast_to(logits[:, :, None], (B, V, S))
    return recon, meta


# ----------------------------------------------------------------------------
# Faithful pure-JAX reference (mirrors the PyTorch code literally, including
# the decoder batch_first quirk).  Used only to sanity-check the kernel.
# ----------------------------------------------------------------------------
def reference_forward(x, params):
    emb = params["emb"][x]                                       # (B, S, E)
    B, S, _ = emb.shape
    R = params["enc_whh"].shape[0]
    L = params["lat_w"].shape[0]

    # encoder RNN (batch_first=True, proper usage)
    h = jnp.zeros((B, R), jnp.float32)
    for t in range(S):
        h = jnp.tanh(emb[:, t, :] @ params["enc_wih"].T + params["enc_bih"]
                     + h @ params["enc_whh"].T + params["enc_bhh"])
    latent = h @ params["lat_w"].T + params["lat_b"]             # (B, L)

    # decode(): latent.unsqueeze(0).repeat(S, 1, 1) -> (S, B, L) fed to a
    # batch_first RNN => "batch" = S, "time" = B.
    latent_rep = jnp.broadcast_to(latent[None], (S, B, L))
    h2 = jnp.zeros((S, R), jnp.float32)
    outs = []
    for t in range(B):
        h2 = jnp.tanh(latent_rep[:, t, :] @ params["dec_wih"].T + params["dec_bih"]
                      + h2 @ params["dec_whh"].T + params["dec_bhh"])
        outs.append(h2)
    rnn_out = jnp.stack(outs, axis=1)                            # (S, B, R)
    out = rnn_out @ params["out_w"].T + params["out_b"]          # (S, B, V)
    recon = jnp.transpose(out, (1, 2, 0))                        # (B, V, S)

    meta = latent @ params["meta_w"].T + params["meta_b"]        # (B, M)
    return recon, meta


def init_params(key, *, char_vocab_size, metadata_dim,
                embedding_dim, rnn_dim, latent_dim):
    ks = jax.random.split(key, 16)
    V, E, R, L, M = char_vocab_size, embedding_dim, rnn_dim, latent_dim, metadata_dim

    def unif(k, shape, fan):
        s = 1.0 / math.sqrt(fan)
        return jax.random.uniform(k, shape, jnp.float32, -s, s)

    return {
        "emb": jax.random.normal(ks[0], (V, E), jnp.float32),
        # encoder RNN
        "enc_wih": unif(ks[1], (R, E), R), "enc_whh": unif(ks[2], (R, R), R),
        "enc_bih": unif(ks[3], (R,), R),   "enc_bhh": unif(ks[4], (R,), R),
        # to_latent
        "lat_w": unif(ks[5], (L, R), R),   "lat_b": unif(ks[6], (L,), R),
        # decoder RNN
        "dec_wih": unif(ks[7], (R, L), R), "dec_whh": unif(ks[8], (R, R), R),
        "dec_bih": unif(ks[9], (R,), R),   "dec_bhh": unif(ks[10], (R,), R),
        # output layer
        "out_w": unif(ks[11], (V, R), R),  "out_b": unif(ks[12], (V,), R),
        # metadata layer
        "meta_w": unif(ks[13], (M, L), L), "meta_b": unif(ks[14], (M,), L),
    }


if __name__ == "__main__":
    # Small, module-consistent shapes.  B=12 exercises the multi-tile grid path
    # (2 batch tiles of 8, last tile partially padded).
    B, S = 12, 8                   # batch, seq_length
    V, M = 32, 8                   # char_vocab_size, metadata_dim
    E, R, L = 16, 32, 16           # embedding_dim, rnn_dim, latent_dim

    key = jax.random.PRNGKey(0)
    k_params, k_x = jax.random.split(key)
    params = init_params(k_params, char_vocab_size=V, metadata_dim=M,
                         embedding_dim=E, rnn_dim=R, latent_dim=L)
    x = jax.random.randint(k_x, (B, S), 0, V, dtype=jnp.int32)

    recon, meta = jax.block_until_ready(char_autoencoder_forward(x, params))
    ref_recon, ref_meta = jax.block_until_ready(reference_forward(x, params))

    assert recon.shape == (B, V, S) and recon.dtype == jnp.float32
    assert meta.shape == (B, M) and meta.dtype == jnp.float32
    assert jnp.allclose(recon, ref_recon, rtol=1e-3, atol=1e-3)
    assert jnp.allclose(meta, ref_meta, rtol=1e-3, atol=1e-3)

    print("KERNEL_OK")
</pallas_src>

<mosaic_0001>
module attributes {stable_mosaic.version = 11 : i64} {
  func.func @kernel(%arg0: i32, %arg1: memref<1x64x32xf32, #tpu.memory_space<vmem>>, %arg2: memref<216x128xf32, #tpu.memory_space<vmem>>, %arg3: memref<8x128xf32, #tpu.memory_space<vmem>>, %arg4: memref<1x32xf32, #tpu.memory_space<vmem>>, %arg5: memref<8x32xf32, #tpu.memory_space<vmem>>) attributes {dimension_semantics = [#tpu.dimension_semantics<arbitrary>], iteration_bounds = array<i64: 2>, scalar_prefetch = 0 : i64, scratch_operands = 2 : i64, tpu.core_type = #tpu.core_type<tc>, window_params = [{transform_indices = @transform_0, window_bounds = array<i64: 1, 64, 32>}, {pipeline_mode = #tpu.pipeline_mode<synchronous>, transform_indices = @transform_1, window_bounds = array<i64: 216, 128>}, {transform_indices = @transform_2, window_bounds = array<i64: 8, 128>}]} {
    %c0_i32 = arith.constant 0 : i32
    %0 = arith.cmpi eq, %arg0, %c0_i32 : i32
    %1 = arith.extui %0 : i1 to i32
    %c0_i32_0 = arith.constant 0 : i32
    %2 = arith.cmpi ne, %1, %c0_i32_0 : i32
    scf.if %2 {
      %cst_50 = arith.constant 0.000000e+00 : f32
      %102 = vector.broadcast %cst_50 : f32 to vector<1x32xf32>
      %c0_51 = arith.constant 0 : index
      %c0_52 = arith.constant 0 : index
      %103 = vector.load %arg4[%c0_51, %c0_52] : memref<1x32xf32, #tpu.memory_space<vmem>>, vector<1x32xf32>
      tpu.vector_store %arg4[%c0_51, %c0_52], %102 {strides = array<i32>} : memref<1x32xf32, #tpu.memory_space<vmem>>, vector<1x32xf32>,
    } else {
    }
    %c0 = arith.constant 0 : index
    %c0_1 = arith.constant 0 : index
    %c0_2 = arith.constant 0 : index
    %3 = vector.load %arg1[%c0, %c0_1, %c0_2] : memref<1x64x32xf32, #tpu.memory_space<vmem>>, vector<1x64x32xf32>
    %4 = vector.shape_cast %3 : vector<1x64x32xf32> to vector<64x32xf32>
    %c0_3 = arith.constant 0 : index
    %c0_4 = arith.constant 0 : index
    %5 = vector.load %arg2[%c0_3, %c0_4] : memref<216x128xf32, #tpu.memory_space<vmem>>, vector<32x32xf32>
    %cst = arith.constant dense<0.000000e+00> : vector<64x32xf32>
    %6 = tpu.matmul %4, %5, %cst {dimension_numbers = #tpu.dot_dimension_numbers<[1], [0], [0], [1], [0, 0, 1, 1], [], []>} : vector<64x32xf32>, vector<32x32xf32>, vector<64x32xf32> -> vector<64x32xf32>
    %c64 = arith.constant 64 : index
    %c0_5 = arith.constant 0 : index
    %7 = vector.load %arg2[%c64, %c0_5] : memref<216x128xf32, #tpu.memory_space<vmem>>, vector<1x32xf32>
    %8 = vector.broadcast %7 : vector<1x32xf32> to vector<64x32xf32>
    %9 = arith.addf %6, %8 : vector<64x32xf32>
    %c32 = arith.constant 32 : index
    %c0_6 = arith.constant 0 : index
    %10 = vector.load %arg2[%c32, %c0_6] : memref<216x128xf32, #tpu.memory_space<vmem>>, vector<32x32xf32>
    %cst_7 = arith.constant 0.000000e+00 : f32
    %11 = vector.broadcast %cst_7 : f32 to vector<8x32xf32>
    %12 = vector.extract_strided_slice %9 {offsets = [0, 0], sizes = [8, 32], strides = [1, 1]} : vector<64x32xf32> to vector<8x32xf32>
    %cst_8 = arith.constant dense<0.000000e+00> : vector<8x32xf32>
    %13 = tpu.matmul %11, %10, %cst_8 {dimension_numbers = #tpu.dot_dimension_numbers<[1], [0], [0], [1], [0, 0, 1, 1], [], []>} : vector<8x32xf32>, vector<32x32xf32>, vector<8x32xf32> -> vector<8x32xf32>
    %14 = arith.addf %12, %13 : vector<8x32xf32>
    %15 = math.tanh %14 : vector<8x32xf32>
    %16 = vector.extract_strided_slice %9 {offsets = [8, 0], sizes = [8, 32], strides = [1, 1]} : vector<64x32xf32> to vector<8x32xf32>
    %cst_9 = arith.constant dense<0.000000e+00> : vector<8x32xf32>
    %17 = tpu.matmul %15, %10, %cst_9 {dimension_numbers = #tpu.dot_dimension_numbers<[1], [0], [0], [1], [0, 0, 1, 1], [], []>} : vector<8x32xf32>, vector<32x32xf32>, vector<8x32xf32> -> vector<8x32xf32>
    %18 = arith.addf %16, %17 : vector<8x32xf32>
    %19 = math.tanh %18 : vector<8x32xf32>
    %20 = vector.extract_strided_slice %9 {offsets = [16, 0], sizes = [8, 32], strides = [1, 1]} : vector<64x32xf32> to vector<8x32xf32>
    %cst_10 = arith.constant dense<0.000000e+00> : vector<8x32xf32>
    %21 = tpu.matmul %19, %10, %cst_10 {dimension_numbers = #tpu.dot_dimension_numbers<[1], [0], [0], [1], [0, 0, 1, 1], [], []>} : vector<8x32xf32>, vector<32x32xf32>, vector<8x32xf32> -> vector<8x32xf32>
    %22 = arith.addf %20, %21 : vector<8x32xf32>
    %23 = math.tanh %22 : vector<8x32xf32>
    %24 = vector.extract_strided_slice %9 {offsets = [24, 0], sizes = [8, 32], strides = [1, 1]} : vector<64x32xf32> to vector<8x32xf32>
    %cst_11 = arith.constant dense<0.000000e+00> : vector<8x32xf32>
    %25 = tpu.matmul %23, %10, %cst_11 {dimension_numbers = #tpu.dot_dimension_numbers<[1], [0], [0], [1], [0, 0, 1, 1], [], []>} : vector<8x32xf32>, vector<32x32xf32>, vector<8x32xf32> -> vector<8x32xf32>
    %26 = arith.addf %24, %25 : vector<8x32xf32>
    %27 = math.tanh %26 : vector<8x32xf32>
    %28 = vector.extract_strided_slice %9 {offsets = [32, 0], sizes = [8, 32], strides = [1, 1]} : vector<64x32xf32> to vector<8x32xf32>
    %cst_12 = arith.constant dense<0.000000e+00> : vector<8x32xf32>
    %29 = tpu.matmul %27, %10, %cst_12 {dimension_numbers = #tpu.dot_dimension_numbers<[1], [0], [0], [1], [0, 0, 1, 1], [], []>} : vector<8x32xf32>, vector<32x32xf32>, vector<8x32xf32> -> vector<8x32xf32>
    %30 = arith.addf %28, %29 : vector<8x32xf32>
    %31 = math.tanh %30 : vector<8x32xf32>
    %32 = vector.extract_strided_slice %9 {offsets = [40, 0], sizes = [8, 32], strides = [1, 1]} : vector<64x32xf32> to vector<8x32xf32>
    %cst_13 = arith.constant dense<0.000000e+00> : vector<8x32xf32>
    %33 = tpu.matmul %31, %10, %cst_13 {dimension_numbers = #tpu.dot_dimension_numbers<[1], [0], [0], [1], [0, 0, 1, 1], [], []>} : vector<8x32xf32>, vector<32x32xf32>, vector<8x32xf32> -> vector<8x32xf32>
    %34 = arith.addf %32, %33 : vector<8x32xf32>
    %35 = math.tanh %34 : vector<8x32xf32>
    %36 = vector.extract_strided_slice %9 {offsets = [48, 0], sizes = [8, 32], strides = [1, 1]} : vector<64x32xf32> to vector<8x32xf32>
    %cst_14 = arith.constant dense<0.000000e+00> : vector<8x32xf32>
    %37 = tpu.matmul %35, %10, %cst_14 {dimension_numbers = #tpu.dot_dimension_numbers<[1], [0], [0], [1], [0, 0, 1, 1], [], []>} : vector<8x32xf32>, vector<32x32xf32>, vector<8x32xf32> -> vector<8x32xf32>
    %38 = arith.addf %36, %37 : vector<8x32xf32>
    %39 = math.tanh %38 : vector<8x32xf32>
    %40 = vector.extract_strided_slice %9 {offsets = [56, 0], sizes = [8, 32], strides = [1, 1]} : vector<64x32xf32> to vector<8x32xf32>
    %cst_15 = arith.constant dense<0.000000e+00> : vector<8x32xf32>
    %41 = tpu.matmul %39, %10, %cst_15 {dimension_numbers = #tpu.dot_dimension_numbers<[1], [0], [0], [1], [0, 0, 1, 1], [], []>} : vector<8x32xf32>, vector<32x32xf32>, vector<8x32xf32> -> vector<8x32xf32>
    %42 = arith.addf %40, %41 : vector<8x32xf32>
    %43 = math.tanh %42 : vector<8x32xf32>
    %c72 = arith.constant 72 : index
    %c0_16 = arith.constant 0 : index
    %44 = vector.load %arg2[%c72, %c0_16] : memref<216x128xf32, #tpu.memory_space<vmem>>, vector<32x32xf32>
    %cst_17 = arith.constant dense<0.000000e+00> : vector<8x32xf32>
    %45 = tpu.matmul %43, %44, %cst_17 {dimension_numbers = #tpu.dot_dimension_numbers<[1], [0], [0], [1], [0, 0, 1, 1], [], []>} : vector<8x32xf32>, vector<32x32xf32>, vector<8x32xf32> -> vector<8x32xf32>
    %c104 = arith.constant 104 : index
    %c0_18 = arith.constant 0 : index
    %46 = vector.load %arg2[%c104, %c0_18] : memref<216x128xf32, #tpu.memory_space<vmem>>, vector<1x32xf32>
    %47 = vector.broadcast %46 : vector<1x32xf32> to vector<8x32xf32>
    %48 = arith.addf %45, %47 : vector<8x32xf32>
    %c112 = arith.constant 112 : index
    %c0_19 = arith.constant 0 : index
    %49 = vector.load %arg2[%c112, %c0_19] : memref<216x128xf32, #tpu.memory_space<vmem>>, vector<32x32xf32>
    %c0_20 = arith.constant 0 : index
    %c0_21 = arith.constant 0 : index
    %50 = vector.load %arg4[%c0_20, %c0_21] : memref<1x32xf32, #tpu.memory_space<vmem>>, vector<1x32xf32>
    %51 = vector.extract_strided_slice %48 {offsets = [0, 0], sizes = [1, 32], strides = [1, 1]} : vector<8x32xf32> to vector<1x32xf32>
    %cst_22 = arith.constant dense<0.000000e+00> : vector<1x32xf32>
    %52 = tpu.matmul %50, %49, %cst_22 {dimension_numbers = #tpu.dot_dimension_numbers<[1], [0], [0], [1], [0, 0, 1, 1], [], []>} : vector<1x32xf32>, vector<32x32xf32>, vector<1x32xf32> -> vector<1x32xf32>
    %53 = arith.addf %51, %52 : vector<1x32xf32>
    %54 = math.tanh %53 : vector<1x32xf32>
    %c0_23 = arith.constant 0 : index
    %c0_24 = arith.constant 0 : index
    %55 = vector.load %arg5[%c0_23, %c0_24] : memref<8x32xf32, #tpu.memory_space<vmem>>, vector<1x32xf32>
    tpu.vector_store %arg5[%c0_23, %c0_24], %54 {strides = array<i32>} : memref<8x32xf32, #tpu.memory_space<vmem>>, vector<1x32xf32>,
    %56 = vector.extract_strided_slice %48 {offsets = [1, 0], sizes = [1, 32], strides = [1, 1]} : vector<8x32xf32> to vector<1x32xf32>
    %cst_25 = arith.constant dense<0.000000e+00> : vector<1x32xf32>
    %57 = tpu.matmul %54, %49, %cst_25 {dimension_numbers = #tpu.dot_dimension_numbers<[1], [0], [0], [1], [0, 0, 1, 1], [], []>} : vector<1x32xf32>, vector<32x32xf32>, vector<1x32xf32> -> vector<1x32xf32>
    %58 = arith.addf %56, %57 : vector<1x32xf32>
    %59 = math.tanh %58 : vector<1x32xf32>
    %c1 = arith.constant 1 : index
    %c0_26 = arith.constant 0 : index
    %60 = vector.load %arg5[%c1, %c0_26] : memref<8x32xf32, #tpu.memory_space<vmem>>, vector<1x32xf32>
    tpu.vector_store %arg5[%c1, %c0_26], %59 {strides = array<i32>} : memref<8x32xf32, #tpu.memory_space<vmem>>, vector<1x32xf32>,
    %61 = vector.extract_strided_slice %48 {offsets = [2, 0], sizes = [1, 32], strides = [1, 1]} : vector<8x32xf32> to vector<1x32xf32>
    %cst_27 = arith.constant dense<0.000000e+00> : vector<1x32xf32>
    %62 = tpu.matmul %59, %49, %cst_27 {dimension_numbers = #tpu.dot_dimension_numbers<[1], [0], [0], [1], [0, 0, 1, 1], [], []>} : vector<1x32xf32>, vector<32x32xf32>, vector<1x32xf32> -> vector<1x32xf32>
    %63 = arith.addf %61, %62 : vector<1x32xf32>
    %64 = math.tanh %63 : vector<1x32xf32>
    %c2 = arith.constant 2 : index
    %c0_28 = arith.constant 0 : index
    %65 = vector.load %arg5[%c2, %c0_28] : memref<8x32xf32, #tpu.memory_space<vmem>>, vector<1x32xf32>
    tpu.vector_store %arg5[%c2, %c0_28], %64 {strides = array<i32>} : memref<8x32xf32, #tpu.memory_space<vmem>>, vector<1x32xf32>,
    %66 = vector.extract_strided_slice %48 {offsets = [3, 0], sizes = [1, 32], strides = [1, 1]} : vector<8x32xf32> to vector<1x32xf32>
    %cst_29 = arith.constant dense<0.000000e+00> : vector<1x32xf32>
    %67 = tpu.matmul %64, %49, %cst_29 {dimension_numbers = #tpu.dot_dimension_numbers<[1], [0], [0], [1], [0, 0, 1, 1], [], []>} : vector<1x32xf32>, vector<32x32xf32>, vector<1x32xf32> -> vector<1x32xf32>
    %68 = arith.addf %66, %67 : vector<1x32xf32>
    %69 = math.tanh %68 : vector<1x32xf32>
    %c3 = arith.constant 3 : index
    %c0_30 = arith.constant 0 : index
    %70 = vector.load %arg5[%c3, %c0_30] : memref<8x32xf32, #tpu.memory_space<vmem>>, vector<1x32xf32>
    tpu.vector_store %arg5[%c3, %c0_30], %69 {strides = array<i32>} : memref<8x32xf32, #tpu.memory_space<vmem>>, vector<1x32xf32>,
    %71 = vector.extract_strided_slice %48 {offsets = [4, 0], sizes = [1, 32], strides = [1, 1]} : vector<8x32xf32> to vector<1x32xf32>
    %cst_31 = arith.constant dense<0.000000e+00> : vector<1x32xf32>
    %72 = tpu.matmul %69, %49, %cst_31 {dimension_numbers = #tpu.dot_dimension_numbers<[1], [0], [0], [1], [0, 0, 1, 1], [], []>} : vector<1x32xf32>, vector<32x32xf32>, vector<1x32xf32> -> vector<1x32xf32>
    %73 = arith.addf %71, %72 : vector<1x32xf32>
    %74 = math.tanh %73 : vector<1x32xf32>
    %c4 = arith.constant 4 : index
    %c0_32 = arith.constant 0 : index
    %75 = vector.load %arg5[%c4, %c0_32] : memref<8x32xf32, #tpu.memory_space<vmem>>, vector<1x32xf32>
    tpu.vector_store %arg5[%c4, %c0_32], %74 {strides = array<i32>} : memref<8x32xf32, #tpu.memory_space<vmem>>, vector<1x32xf32>,
    %76 = vector.extract_strided_slice %48 {offsets = [5, 0], sizes = [1, 32], strides = [1, 1]} : vector<8x32xf32> to vector<1x32xf32>
    %cst_33 = arith.constant dense<0.000000e+00> : vector<1x32xf32>
    %77 = tpu.matmul %74, %49, %cst_33 {dimension_numbers = #tpu.dot_dimension_numbers<[1], [0], [0], [1], [0, 0, 1, 1], [], []>} : vector<1x32xf32>, vector<32x32xf32>, vector<1x32xf32> -> vector<1x32xf32>
    %78 = arith.addf %76, %77 : vector<1x32xf32>
    %79 = math.tanh %78 : vector<1x32xf32>
    %c5 = arith.constant 5 : index
    %c0_34 = arith.constant 0 : index
    %80 = vector.load %arg5[%c5, %c0_34] : memref<8x32xf32, #tpu.memory_space<vmem>>, vector<1x32xf32>
    tpu.vector_store %arg5[%c5, %c0_34], %79 {strides = array<i32>} : memref<8x32xf32, #tpu.memory_space<vmem>>, vector<1x32xf32>,
    %81 = vector.extract_strided_slice %48 {offsets = [6, 0], sizes = [1, 32], strides = [1, 1]} : vector<8x32xf32> to vector<1x32xf32>
    %cst_35 = arith.constant dense<0.000000e+00> : vector<1x32xf32>
    %82 = tpu.matmul %79, %49, %cst_35 {dimension_numbers = #tpu.dot_dimension_numbers<[1], [0], [0], [1], [0, 0, 1, 1], [], []>} : vector<1x32xf32>, vector<32x32xf32>, vector<1x32xf32> -> vector<1x32xf32>
    %83 = arith.addf %81, %82 : vector<1x32xf32>
    %84 = math.tanh %83 : vector<1x32xf32>
    %c6 = arith.constant 6 : index
    %c0_36 = arith.constant 0 : index
    %85 = vector.load %arg5[%c6, %c0_36] : memref<8x32xf32, #tpu.memory_space<vmem>>, vector<1x32xf32>
    tpu.vector_store %arg5[%c6, %c0_36], %84 {strides = array<i32>} : memref<8x32xf32, #tpu.memory_space<vmem>>, vector<1x32xf32>,
    %86 = vector.extract_strided_slice %48 {offsets = [7, 0], sizes = [1, 32], strides = [1, 1]} : vector<8x32xf32> to vector<1x32xf32>
    %cst_37 = arith.constant dense<0.000000e+00> : vector<1x32xf32>
    %87 = tpu.matmul %84, %49, %cst_37 {dimension_numbers = #tpu.dot_dimension_numbers<[1], [0], [0], [1], [0, 0, 1, 1], [], []>} : vector<1x32xf32>, vector<32x32xf32>, vector<1x32xf32> -> vector<1x32xf32>
    %88 = arith.addf %86, %87 : vector<1x32xf32>
    %89 = math.tanh %88 : vector<1x32xf32>
    %c7 = arith.constant 7 : index
    %c0_38 = arith.constant 0 : index
    %90 = vector.load %arg5[%c7, %c0_38] : memref<8x32xf32, #tpu.memory_space<vmem>>, vector<1x32xf32>
    tpu.vector_store %arg5[%c7, %c0_38], %89 {strides = array<i32>} : memref<8x32xf32, #tpu.memory_space<vmem>>, vector<1x32xf32>,
    %c0_39 = arith.constant 0 : index
    %c0_40 = arith.constant 0 : index
    %91 = vector.load %arg4[%c0_39, %c0_40] : memref<1x32xf32, #tpu.memory_space<vmem>>, vector<1x32xf32>
    tpu.vector_store %arg4[%c0_39, %c0_40], %89 {strides = array<i32>} : memref<1x32xf32, #tpu.memory_space<vmem>>, vector<1x32xf32>,
    %c0_41 = arith.constant 0 : index
    %c0_42 = arith.constant 0 : index
    %92 = vector.load %arg5[%c0_41, %c0_42] : memref<8x32xf32, #tpu.memory_space<vmem>>, vector<8x32xf32>
    %c144 = arith.constant 144 : index
    %c0_43 = arith.constant 0 : index
    %93 = vector.load %arg2[%c144, %c0_43] : memref<216x128xf32, #tpu.memory_space<vmem>>, vector<32x128xf32>
    %cst_44 = arith.constant dense<0.000000e+00> : vector<8x128xf32>
    %94 = tpu.matmul %92, %93, %cst_44 {dimension_numbers = #tpu.dot_dimension_numbers<[1], [0], [0], [1], [0, 0, 1, 1], [], []>} : vector<8x32xf32>, vector<32x128xf32>, vector<8x128xf32> -> vector<8x128xf32>
    %c176 = arith.constant 176 : index
    %c0_45 = arith.constant 0 : index
    %95 = vector.load %arg2[%c176, %c0_45] : memref<216x128xf32, #tpu.memory_space<vmem>>, vector<32x128xf32>
    %cst_46 = arith.constant dense<0.000000e+00> : vector<8x128xf32>
    %96 = tpu.matmul %43, %95, %cst_46 {dimension_numbers = #tpu.dot_dimension_numbers<[1], [0], [0], [1], [0, 0, 1, 1], [], []>} : vector<8x32xf32>, vector<32x128xf32>, vector<8x128xf32> -> vector<8x128xf32>
    %97 = arith.addf %94, %96 : vector<8x128xf32>
    %c208 = arith.constant 208 : index
    %c0_47 = arith.constant 0 : index
    %98 = vector.load %arg2[%c208, %c0_47] : memref<216x128xf32, #tpu.memory_space<vmem>>, vector<1x128xf32>
    %99 = vector.broadcast %98 : vector<1x128xf32> to vector<8x128xf32>
    %100 = arith.addf %97, %99 : vector<8x128xf32>
    %c0_48 = arith.constant 0 : index
    %c0_49 = arith.constant 0 : index
    %101 = vector.load %arg3[%c0_48, %c0_49] : memref<8x128xf32, #tpu.memory_space<vmem>>, vector<8x128xf32>
    tpu.vector_store %arg3[%c0_48, %c0_49], %100 {strides = array<i32>} : memref<8x128xf32, #tpu.memory_space<vmem>>, vector<8x128xf32>,
    return
  }
  func.func @transform_0(%arg0: i32) -> (i32, i32, i32) {
    %c0_i32 = arith.constant 0 : i32
    %c0_i32_0 = arith.constant 0 : i32
    %c0_i32_1 = arith.constant 0 : i32
    return %arg0, %c0_i32, %c0_i32_0 : i32, i32, i32
  }
  func.func @transform_1(%arg0: i32) -> (i32, i32) {
    %c0_i32 = arith.constant 0 : i32
    %c0_i32_0 = arith.constant 0 : i32
    %c0_i32_1 = arith.constant 0 : i32
    return %c0_i32, %c0_i32_0 : i32, i32
  }
  func.func @transform_2(%arg0: i32) -> (i32, i32) {
    %c0_i32 = arith.constant 0 : i32
    %c0_i32_0 = arith.constant 0 : i32
    return %arg0, %c0_i32 : i32, i32
  }
}

</mosaic_0001>

<bundles_post_ra>
// kernel: tpu_custom_call.1
= control target key start
LH: loop header
LB: loop body
LE: loop exit
PB: predicated region body
PF: predicated region fallthrough
CT: control target
= control target key end

     0   :  { %7 = vsyncpa [#allocation5], 0  ;;  %s2927_s0 = inlined_call_operand.vmem [shape: f32[2,64,32], index: 0, kind: input, shape index: {}]   ;;  %s2928_s1 = inlined_call_operand.hbm [shape: f32[216,128], index: 1, kind: input, shape index: {}]   ;;  %s2929_s2 = inlined_call_operand.hbm [shape: f32[16,128], index: 2, kind: output, shape index: {}]  }
   0x1   :  { %8 = vsyncpa [#allocation6], 0 }
   0x2   :  { %10 = vsyncpa [#allocation6 + $0x1], 0  ;;  %s2598_s9 = smov 0   ;;  %s2600_s10 = smov 0  }
   0x3   :  { %s2602_s11 = smov 0   ;;  %s2604_s12 = smov 0  }
   0x4 LB: > { %s2619_s13 = sadd.s32 4294967295, %s2573_s12   ;;  %s1889_s14 = sadd.s32 4294967294, %s2573_s12   ;;  %s2573_s12 = sphi %s2604_s12, %s2946_s12   ;;  %s2569_s11 = sphi %s2602_s11, %s2945_s11   ;;  %s2565_s10 = sphi %s2600_s10, %s2944_s10   ;;  %s2561_s9 = sphi %s2598_s9, %s2943_s9  }
   0x5   : > { %s2623_s15 = sadd.s32 1, %s2573_s12   ;;  %s70_s16 = sadd.s32 1, %s2569_s11 }
   0x6   : > { %s67_s17 = ssub.s32 %s2573_s12, %s2623_s15  ;;  %p80_p0 = scmp.ne.s32.totalorder %s2569_s11, %s2565_s10 }
   0x7   : > { %p68_p1 = scmp.eq.s32.totalorder %s67_s17, 0  ;;  %p81_p2 = scmp.eq.s32.totalorder %s2619_s13, 1 }
   0x8   : > { %p86_p3 = scmp.ne.s32.totalorder %s2565_s10, %s2561_s9  ;;  %p87_p4 = scmp.eq.s32.totalorder %s1889_s14, 1 }
   0x9   : > { %s2634_s18 = scalar_select %p68_p1, %s2569_s11, %s70_s16  }
   0xa   : > { %p2636_p5 = por %p81_p2, %p80_p0  ;;  %p2640_p6 = por %p87_p4, %p86_p3 }
   0xb   : > { %p1890_p7 = scmp.ge.s32.totalorder %s2573_s12, 1  ;;  %p94_p8 = scmp.lt.s32.totalorder %s2573_s12, 3 }
   0xc   : > { %s2933_s19 = scalar_select %p2636_p5, 1, 0 }
   0xd   : > { %s2934_s20 = scalar_select %p2640_p6, 1, 0 }
   0xe   : > { %p2930_p10 = scmp.eq.s32.totalorder %s2619_s13, 0  ;;  %p2648_p11 = pnand %p1890_p7, %p94_p8 }
   0xf   : > { %s2575_s22 = smov [#allocation4]   ;;  %s2479_s27 = scalar_lea.hbm %s2928_s1, 3456 }
  0x10   : > { %s2935_s21 = scalar_select %p2648_p11, 1, 0 }
  0x11   : > { %s106_s23 = sshll.u32 %s2575_s22, 4  ;;  %p2397_p12 = pneg %p2648_p11  ;;  %s107_s23 = int_to_ptr.vmem [resolvable:$true] %s106_s23 }
  0x12   : > { %p2480_p0 = scmp.ne.s32.totalorder %s2928_s1, %s2479_s27  ;;  %p2486_p4 = scmp.lt.u32.totalorder %s2479_s27, %s2928_s1 }
  0x13   : > { %p2656_p13 = pnand %p2930_p10, %p2397_p12 }
  0x15   : > { %p2481_p1 = pneg %p2656_p13 }
  0x17   : > { %p2482_p2 = pnand %p2481_p1, %p2480_p0 }
  0x19   : > { %p2483_p3 = pneg %p2482_p2 }
  0x1b   : > { %p2488_p7 = pnand %p2486_p4, %p2483_p3 }
  0x1d   : > { %2491 = shalt.err (!%p2488_p7)
}
  0x1e   : > { %s2492_s4 = scalar_lea.vmem %s107_s23, 3456  ;;  %p2500_p10 = scmp.lt.s32.totalorder %s107_s23, %s107_s23 }
  0x1f   : > { %p2493_p8 = scmp.ne.s32.totalorder %s107_s23, %s2492_s4  ;;  %p2501_p6 = scmp.lt.s32.totalorder %s2492_s4, %s2492_s4 }
  0x21   : > { %p2495_p12 = pnand %p2493_p8, %p2481_p1  ;;  %p2502_p5 = por %p2501_p6, %p2500_p10 }
  0x23   : > { %p2496_p9 = pneg %p2495_p12 }
  0x25   : > { %p2503_p11 = pnand %p2502_p5, %p2496_p9 }
  0x27   : > { %2506 = shalt.err (!%p2503_p11)
}
  0x28   : > { %s2576_s5 = smov 128   ;;  %s2577_s6 = smov 8  }
  0x29   : > { %2400 = dma.hbm_to_vmem [thread:$0]  (!%p2656_p13), %s2928_s1, 3456, %s107_s23, [#allocation5], %s2576_s5, %s2576_s5, %s2577_s6  }
  0x2a   : > { %p2937_p0 = scmp.ne.s32.totalorder %s2935_s21, 0 }
  0x2b   : > { %p2938_p2 = scmp.eq.s32.totalorder (!%p2937_p0), %s2619_s13, 0 }
  0x2c   : > { %130 = sbr.rel (%p2937_p0) target bundleno = 3942 (0xf66), region = 28 }
  0x33   : > { %2552 = dma.done.wait (%p2938_p2), [#allocation5], 3456   ;;  %p2939_p1 = pmov %p2938_p2 }
  0x34   : > { %s149_s14 = sand.u32 1, %s2565_s10   ;;  %p152_p5 = scmp.lt.s32.totalorder %s2619_s13, 1 }
  0x35   : > { %2554 = vsyncadd (%p2939_p1), [#allocation5], 4294963840  ;;  %s2686_s16 = sshll.u32 %s149_s14, 3  ;;  %p2940_p6 = scmp.ne.s32.totalorder %s2619_s13, 0 }
  0x36   : > { %s153_s17 = scalar_select %p152_p5, %s2619_s13, 1 }
  0x37   : > { %s151_s25 = scalar_lea.vmem [#allocation7], %s2686_s16  ;;  %160 = sbr.rel (%p2940_p6) target bundleno = 62 (0x3e), region = 36  ;;  %vm161_vm0 = vcmask (!%p2940_p6), 253952   ;;  %v2578_v0 = vmov (!%p2940_p6), 0.0  }
  0x38   : > { %s1932_s22 = sshll.u32 %s153_s17, 6  ;;  %162 = vst.msk [vmem:[#allocation2] sm:$0x1] (!%p2940_p6), %vm161_vm0, %v2578_v0 }
  0x39   : > { %s2692_s24 = scalar_lea.vmem %s2927_s0, %s1932_s22 }
  0x3e PF: > { %v171_v1 = vld [vmem:[#allocation4] sm:$0xff]  ;;  %v172_v2 = vld [vmem:[#allocation4 + $0x8] sm:$0xff]  ;;  %vm180_vm1 = vcmask 261120   ;;  %v2579_v5 = vmov 0.0|0.0   ;;  %v173_v7 = vld [vmem:[#allocation4 + $0x10] sm:$0xff]  ;;  %vm2580_vm2 = vmmov 0  }
  0x3f   : > { %v310_v3 = vld [vmem:[#allocation4 + $0x20] sm:$0xff]  ;;  %v2269_v4 = vpack.c.bf16 %v172_v2, %v171_v1  ;;  %2277 = vmatprep.subr.bf16.mxu1 %v2579_v5  ;;  %v311_v6 = vld [vmem:[#allocation4 + $0x28] sm:$0xff]  ;;  %v174_v8 = vld [vmem:[#allocation4 + $0x18] sm:$0xff]  ;;  %v2581_v14 = vmov 0.0   ;;  %vm1076_vm3 = vcmask 253952   ;;  %vm1156_vm4 = vcmask 254977  }
  0x40   : > { %v2698_v9 = vpack.c.bf16 %v311_v6, %v310_v3  ;;  %v2273_v10 = vpack.c.bf16 %v174_v8, %v173_v7  ;;  %v163_v11 = vld [vmem:[%s2692_s24] sm:$0xff]  ;;  %2068 = vmatprep.mubr.msk.f32.mxu1 %vm2580_vm2, %v2581_v14  ;;  %v164_v16 = vld [vmem:[%s2692_s24 + $0x8] sm:$0xff]  ;;  %v165_v17 = vld [vmem:[%s2692_s24 + $0x10] sm:$0xff]  ;;  %vm1237_vm5 = vcmask 256002   ;;  %vm1318_vm6 = vcmask 257027   ;;  %s1929_s26 = sshll.u32 %s2619_s13, 7 }
  0x41   : > { %v312_v12 = vld [vmem:[#allocation4 + $0x30] sm:$0xff]  ;;  %v313_v13 = vld [vmem:[#allocation4 + $0x38] sm:$0xff]  ;;  %2270 = vmatprep.subr.bf16.mxu0 %v2269_v4  ;;  %2048 = vmatprep.mubr.msk.f32.mxu0 %vm180_vm1, %v163_v11  ;;  %v2726_v18 = vld [vmem:[#allocation4 + $0x40] ss:$0 sm:$0xff]  ;;  %vm1399_vm7 = vcmask 258052   ;;  %vm1480_vm8 = vcmask 259077   ;;  %s2881_s30 = scalar_lea.hbm %s2929_s2, %s1929_s26 }
  0x42   : > { %2272 = vmatpush3.bf16.msra.mxu0 %v2269_v4  ;;  %2279 = vmatpush3.bf16.msra.mxu1 %v2698_v9  ;;  %v2705_v15 = vpack.c.bf16 %v313_v13, %v312_v12  ;;  %v166_v26 = vld [vmem:[%s2692_s24 + $0x18] sm:$0xff]  ;;  %v167_v27 = vld [vmem:[%s2692_s24 + $0x20] sm:$0xff]  ;;  %v168_v28 = vld [vmem:[%s2692_s24 + $0x28] sm:$0xff]  ;;  %vm1561_vm9 = vcmask 260102   ;;  %vm1642_vm10 = vcmask 261127   ;;  %s1818_s27 = sshll.u32 %s151_s25, 4  ;;  %s2883_s27 = int_to_ptr.vmem [resolvable:$true] %s1818_s27 }
  0x43   : > { %2274 = vmatprep.subr.bf16.mxu0 %v2273_v10  ;;  %2280 = vmatprep.subr.bf16.mxu1 %v2579_v5  ;;  %v169_v29 = vld [vmem:[%s2692_s24 + $0x30] sm:$0xff]  ;;  %v170_v30 = vld [vmem:[%s2692_s24 + $0x38] sm:$0xff]  ;;  %v997_v8 = vld [vmem:[#allocation4 + $0x78] sm:$0xff]  ;;  %s1805_s3 = scalar_lea.sflag [#allocation6], %s149_s14  ;;  %s2507_s13 = scalar_lea.vmem %s2883_s27, 128 }
  0x44   : > { %v914_v3 = vld [vmem:[#allocation4 + $0x48] sm:$0xff]  ;;  %v915_v4 = vld [vmem:[#allocation4 + $0x50] sm:$0xff]  ;;  %v998_v12 = vld [vmem:[#allocation4 + $0x80] sm:$0xff]  ;;  %p2508_p9 = scmp.ne.s32.totalorder %s2883_s27, %s2507_s13  ;;  %p2941_p10 = scmp.ne.s32.totalorder %s2933_s19, 0 }
  0x45   : > { %v996_v6 = vld [vmem:[#allocation4 + $0x70] sm:$0xff]  ;;  %v2326_v7 = vpack.c.bf16 %v915_v4, %v914_v3  ;;  %v999_v13 = vld [vmem:[#allocation4 + $0x88] sm:$0xff]  ;;  %s2582_s4 = smov [#allocation7]  }
  0x46   : > { %2276 = vmatpush3.bf16.msra.mxu0 %v2273_v10  ;;  %2282 = vmatpush3.bf16.msra.mxu1 %v2705_v15  ;;  %v917_v10 = vld [vmem:[#allocation4 + $0x60] sm:$0xff]  ;;  %v2790_v11 = vpack.c.bf16 %v997_v8, %v996_v6  ;;  %p2509_p11 = pnand %p2508_p9, %p2941_p10  ;;  %s2511_s5 = sshll.u32 %s2582_s4, 4  ;;  %s2512_s5 = int_to_ptr.vmem [resolvable:$false] %s2511_s5 }
  0x47   : > { %2283 = vmatprep.subr.bf16.mxu1 %v2579_v5  ;;  %2289 = vmatprep.subr.bf16.mxu0 %v2579_v5  ;;  %s2513_s6 = scalar_lea.vmem %s2512_s5, 256  ;;  %p2514_p3 = scmp.lt.s32.totalorder %s2883_s27, %s2512_s5 }
  0x48   : > { %p2510_p13 = pneg %p2509_p11  ;;  %p2515_p4 = scmp.lt.s32.totalorder %s2513_s6, %s2507_s13 }
  0x49   : > { %2049 = vmatmul.mubr.msk.f32.vlgmr.msra.gmra.mrb[0].mxu0 %vm180_vm1, %v164_v16  ;;  %2069 = vmatmul.mubr.f32.vlgmr.msra.gmra.mrb[0].mxu1 %v2581_v14  ;;  %v2794_v16 = vpack.c.bf16 %v999_v13, %v998_v12  ;;  %v1646_v12 = vld [vmem:[#allocation4 + $0x90] sm:$0xff]  ;;  %v1647_v13 = vld [vmem:[#allocation4 + $0x98] sm:$0xff] }
  0x4a   : > { %2285 = vmatpush3.bf16.msra.mxu1 %v2698_v9  ;;  %2079 = vmatprep.mubr.msk.f32.mxu1 %vm2580_vm2, %v2581_v14  ;;  %p2516_p7 = por %p2515_p4, %p2514_p3 }
  0x4b   : > { %2286 = vmatprep.subr.bf16.mxu1 %v2579_v5  ;;  %2291 = vmatpush3.bf16.msra.mxu0 %v2698_v9 }
  0x4c   : > { %2292 = vmatprep.subr.bf16.mxu0 %v2579_v5  ;;  %2051 = vmatprep.mubr.msk.f32.mxu0 %vm180_vm1, %v165_v17  ;;  %v1000_v17 = vld [vmem:[#allocation2] sm:$0x1]  ;;  %p2517_p8 = pnand %p2516_p7, %p2510_p13 }
  0x4d   : > { %2052 = vmatmul.mubr.msk.f32.gmra.mrb[2].mxu0 %vm180_vm1, %v166_v26 }
  0x4e   : > { %2288 = vmatpush3.bf16.msra.mxu1 %v2705_v15  ;;  %2054 = vmatprep.mubr.msk.f32.mxu0 %vm180_vm1, %v167_v27 }
  0x4f   : > { %2294 = vmatpush3.bf16.msra.mxu0 %v2705_v15  ;;  %2295 = vmatprep.subr.bf16.mxu1 %v2579_v5 }
  0x50   : > { %2301 = vmatprep.subr.bf16.mxu0 %v2579_v5 }
  0x51   : > { %2055 = vmatmul.mubr.msk.f32.gmra.mrb[4].mxu0 %vm180_vm1, %v168_v28 }
  0x52   : > { %2057 = vmatprep.mubr.msk.f32.mxu0 %vm180_vm1, %v169_v29 }
  0x55   : > { %2058 = vmatmul.mubr.msk.f32.gmra.mrb[6].mxu0 %vm180_vm1, %v170_v30 }
  0x56   : > { %2090 = vmatprep.mubr.msk.f32.mxu0 %vm2580_vm2, %v2581_v14 }
 0x11c   : > { %v2050_v19 = vpop.f32.mrb[0].mxu0  ;;  %v383_v20 = vpop.f32.mrb[0].mxu1 }
 0x11d   : > { %v271_v21 = vpop.f32.mrb[1].mxu0  ;;  %v2070_v22 = vpop.f32.mrb[1].mxu1  ;;  %v277_v31 = vadd.f32 %v2050_v19, %v2726_v18 }
 0x11e   : > { %v272_v23 = vadd.f32 %v2726_v18, %v271_v21 }
 0x120   : > { %v387_v24 = vadd.f32 %v383_v20, %v272_v23  ;;  %v2053_v36 = vpop.f32.mrb[2].mxu0 }
 0x121   : > { %v281_v37 = vpop.f32.mrb[3].mxu0  ;;  %v287_v47 = vadd.f32 %v2053_v36, %v2726_v18 }
 0x122   : > { %2447 = vtanh.f32 %v387_v24  ;;  %v282_v42 = vadd.f32 %v2726_v18, %v281_v37 }
 0x124   : > { %v2056_v38 = vpop.f32.mrb[4].mxu0 }
 0x125   : > { %v291_v39 = vpop.f32.mrb[5].mxu0  ;;  %v297_v57 = vadd.f32 %v2056_v38, %v2726_v18 }
 0x126   : > { %v292_v52 = vadd.f32 %v2726_v18, %v291_v39 }
 0x128   : > { %v2756_v40 = vpop.f32.mrb[6].mxu0 }
 0x129   : > { %v301_v41 = vpop.f32.mrb[7].mxu0  ;;  %v307_v19 = vadd.f32 %v2756_v40, %v2726_v18 }
 0x12a   : > { %v302_v62 = vadd.f32 %v2726_v18, %v301_v41 }
 0x12c   : > { %v2448_v25 = vpop.eup %2447 }
 0x12d   : > { %2080 = vmatmul.mubr.msk.f32.vlgmr.msra.gmra.mrb[2].mxu1 %vm180_vm1, %v2448_v25  ;;  %v1915_v25 = vld [vmem:[#allocation4 + $0x68] ss:$0 sm:$0xff] }
 0x12e   : > { %2297 = vmatpush3.bf16.msra.mxu1 %v2698_v9  ;;  %2101 = vmatprep.mubr.msk.f32.mxu1 %vm2580_vm2, %v2581_v14 }
 0x12f   : > { %2298 = vmatprep.subr.bf16.mxu1 %v2579_v5 }
 0x132   : > { %2300 = vmatpush3.bf16.msra.mxu1 %v2705_v15 }
 0x133   : > { %2307 = vmatprep.subr.bf16.mxu1 %v2579_v5 }
 0x200   : > { %v458_v32 = vpop.f32.mrb[2].mxu1 }
 0x201   : > { %v462_v33 = vadd.f32 %v458_v32, %v277_v31  ;;  %v2081_v34 = vpop.f32.mrb[3].mxu1 }
 0x203   : > { %2449 = vtanh.f32 %v462_v33 }
 0x20d   : > { %v2450_v35 = vpop.eup %2449 }
 0x20e   : > { %2091 = vmatmul.mubr.msk.f32.vlgmr.msra.gmra.mrb[8].mxu0 %vm180_vm1, %v2450_v35 }
 0x20f   : > { %2303 = vmatpush3.bf16.msra.mxu0 %v2698_v9  ;;  %2112 = vmatprep.mubr.msk.f32.mxu0 %vm2580_vm2, %v2581_v14 }
 0x210   : > { %2304 = vmatprep.subr.bf16.mxu0 %v2579_v5 }
 0x213   : > { %2306 = vmatpush3.bf16.msra.mxu0 %v2705_v15 }
 0x214   : > { %2313 = vmatprep.subr.bf16.mxu0 %v2579_v5 }
 0x2e1   : > { %v533_v43 = vpop.f32.mrb[8].mxu0 }
 0x2e2   : > { %v537_v44 = vadd.f32 %v533_v43, %v282_v42  ;;  %v2092_v45 = vpop.f32.mrb[9].mxu0 }
 0x2e4   : > { %2451 = vtanh.f32 %v537_v44 }
 0x2ee   : > { %v2452_v46 = vpop.eup %2451 }
 0x2ef   : > { %2102 = vmatmul.mubr.msk.f32.vlgmr.msra.gmra.mrb[4].mxu1 %vm180_vm1, %v2452_v46 }
 0x2f0   : > { %2309 = vmatpush3.bf16.msra.mxu1 %v2698_v9  ;;  %2123 = vmatprep.mubr.msk.f32.mxu1 %vm2580_vm2, %v2581_v14 }
 0x2f1   : > { %2310 = vmatprep.subr.bf16.mxu1 %v2579_v5 }
 0x2f4   : > { %2312 = vmatpush3.bf16.msra.mxu1 %v2705_v15 }
 0x2f5   : > { %2319 = vmatprep.subr.bf16.mxu1 %v2579_v5 }
 0x3c2   : > { %v608_v48 = vpop.f32.mrb[4].mxu1 }
 0x3c3   : > { %v612_v49 = vadd.f32 %v608_v48, %v287_v47  ;;  %v2103_v50 = vpop.f32.mrb[5].mxu1 }
 0x3c5   : > { %2453 = vtanh.f32 %v612_v49 }
 0x3cf   : > { %v2454_v51 = vpop.eup %2453 }
 0x3d0   : > { %2113 = vmatmul.mubr.msk.f32.vlgmr.msra.gmra.mrb[10].mxu0 %vm180_vm1, %v2454_v51 }
 0x3d1   : > { %2315 = vmatpush3.bf16.msra.mxu0 %v2698_v9  ;;  %2134 = vmatprep.mubr.msk.f32.mxu0 %vm2580_vm2, %v2581_v14 }
 0x3d2   : > { %2316 = vmatprep.subr.bf16.mxu0 %v2579_v5 }
 0x3d5   : > { %2318 = vmatpush3.bf16.msra.mxu0 %v2705_v15 }
 0x3d6   : > { %2325 = vmatprep.subr.bf16.mxu0 %v2579_v5 }
 0x4a3   : > { %v683_v53 = vpop.f32.mrb[10].mxu0 }
 0x4a4   : > { %v687_v54 = vadd.f32 %v683_v53, %v292_v52  ;;  %v2114_v55 = vpop.f32.mrb[11].mxu0 }
 0x4a6   : > { %2455 = vtanh.f32 %v687_v54 }
 0x4b0   : > { %v2456_v56 = vpop.eup %2455 }
 0x4b1   : > { %2124 = vmatmul.mubr.msk.f32.vlgmr.msra.gmra.mrb[6].mxu1 %vm180_vm1, %v2456_v56 }
 0x4b2   : > { %2321 = vmatpush3.bf16.msra.mxu1 %v2698_v9  ;;  %2145 = vmatprep.mubr.msk.f32.mxu1 %vm2580_vm2, %v2581_v14  ;;  %v916_v9 = vld [vmem:[#allocation4 + $0x58] sm:$0xff] }
 0x4b3   : > { %2322 = vmatprep.subr.bf16.mxu1 %v2579_v5 }
 0x4b6   : > { %2324 = vmatpush3.bf16.msra.mxu1 %v2705_v15  ;;  %v2329_v15 = vpack.c.bf16 %v917_v10, %v916_v9 }
 0x4b7   : > { %2331 = vmatprep.subr.bf16.mxu1 %v2579_v5 }
 0x584   : > { %v758_v58 = vpop.f32.mrb[6].mxu1 }
 0x585   : > { %v762_v59 = vadd.f32 %v758_v58, %v297_v57  ;;  %v2125_v60 = vpop.f32.mrb[7].mxu1 }
 0x586   : > { %v1651_v60 = vld [vmem:[#allocation4 + $0xb8] sm:$0xff] }
 0x587   : > { %2457 = vtanh.f32 %v762_v59  ;;  %v1650_v59 = vld [vmem:[#allocation4 + $0xb0] sm:$0xff] }
 0x591   : > { %v2458_v61 = vpop.eup %2457 }
 0x592   : > { %2135 = vmatmul.mubr.msk.f32.vlgmr.msra.gmra.mrb[12].mxu0 %vm180_vm1, %v2458_v61 }
 0x593   : > { %2156 = vmatprep.mubr.msk.f32.mxu0 %vm2580_vm2, %v2581_v14  ;;  %2327 = vmatpush3.bf16.msra.mxu0 %v2326_v7 }
 0x594   : > { %2328 = vmatprep.subr.bf16.mxu0 %v2579_v5 }
 0x597   : > { %2330 = vmatpush3.bf16.msra.mxu0 %v2329_v15  ;;  %v2386_v15 = vpack.c.bf16 %v1647_v13, %v1646_v12 }
 0x598   : > { %2337 = vmatprep.subr.bf16.mxu0 %v2579_v5 }
 0x665   : > { %v833_v63 = vpop.f32.mrb[12].mxu0 }
 0x666   : > { %v837_v0 = vadd.f32 %v833_v63, %v302_v62  ;;  %v2136_v1 = vpop.f32.mrb[13].mxu0  ;;  %v2380_v62 = vpack.c.bf16 %v1651_v60, %v1650_v59 }
 0x667   : > { %v1653_v1 = vld [vmem:[#allocation4 + $0xc8] sm:$0xff] }
 0x668   : > { %2459 = vtanh.f32 %v837_v0  ;;  %v1652_v0 = vld [vmem:[#allocation4 + $0xc0] sm:$0xff] }
 0x672   : > { %v2460_v2 = vpop.eup %2459 }
 0x673   : > { %2146 = vmatmul.mubr.msk.f32.vlgmr.msra.gmra.mrb[8].mxu1 %vm180_vm1, %v2460_v2  ;;  %v2383_v2 = vpack.c.bf16 %v1653_v1, %v1652_v0 }
 0x674   : > { %2167 = vmatprep.mubr.msk.f32.mxu1 %vm2580_vm2, %v2581_v14  ;;  %2333 = vmatpush3.bf16.msra.mxu1 %v2790_v11 }
 0x675   : > { %2334 = vmatprep.subr.bf16.mxu1 %v2579_v5 }
 0x678   : > { %2336 = vmatpush3.bf16.msra.mxu1 %v2794_v16 }
 0x679   : > { %2343 = vmatprep.subr.bf16.mxu1 %v2579_v5 }
 0x67b   : > { %2168 = vmatmul.mubr.msk.f32.vlgmr.msra.gmra.mrb[10].mxu1 %vm180_vm1, %v1000_v17  ;;  %v1649_v17 = vld [vmem:[#allocation4 + $0xa8] sm:$0xff] }
 0x67c   : > { %2345 = vmatpush3.bf16.msra.mxu1 %v2790_v11  ;;  %2189 = vmatprep.mubr.msk.f32.mxu1 %vm2580_vm2, %v2581_v14 }
 0x67d   : > { %2346 = vmatprep.subr.bf16.mxu1 %v2579_v5 }
 0x680   : > { %2348 = vmatpush3.bf16.msra.mxu1 %v2794_v16 }
 0x681   : > { %2355 = vmatprep.subr.bf16.mxu1 %v2579_v5 }
 0x746   : > { %v908_v20 = vpop.f32.mrb[8].mxu1 }
 0x747   : > { %v912_v21 = vadd.f32 %v908_v20, %v307_v19  ;;  %v2147_v22 = vpop.f32.mrb[9].mxu1 }
 0x749   : > { %2461 = vtanh.f32 %v912_v21 }
 0x74e   : > { %v1070_v18 = vpop.f32.mrb[10].mxu1 }
 0x74f   : > { %v2169_v24 = vpop.f32.mrb[11].mxu1 }
 0x753   : > { %v2809_v23 = vpop.eup %2461 }
 0x754   : > { %2157 = vmatmul.mubr.msk.f32.vlgmr.msra.gmra.mrb[14].mxu0 %vm180_vm1, %v2809_v23 }
 0x755   : > { %2339 = vmatpush3.bf16.msra.mxu0 %v2790_v11  ;;  %2178 = vmatprep.mubr.msk.f32.mxu0 %vm2580_vm2, %v2581_v14 }
 0x756   : > { %2340 = vmatprep.subr.bf16.mxu0 %v2579_v5 }
 0x759   : > { %2342 = vmatpush3.bf16.msra.mxu0 %v2794_v16 }
 0x75a   : > { %2349 = vmatprep.subr.bf16.mxu0 %v2579_v5 }
 0x827   : > { %v992_v26 = vpop.f32.mrb[14].mxu0 }
 0x828   : > { %v2819_v27 = vadd.f32 %v1915_v25, %v992_v26  ;;  %v2158_v28 = vpop.f32.mrb[15].mxu0 }
 0x82a   : > { %v1074_v29 = vadd.f32 %v1070_v18, %v2819_v27 }
 0x82c   : > { %2463 = vtanh.f32 %v1074_v29 }
 0x836   : > { %v2464_v30 = vpop.eup %2463 }
 0x837   : > { %1077 = vst.msk [vmem:[#allocation3] sm:$0x1] %vm1076_vm3, %v2464_v30  ;;  %2179 = vmatmul.mubr.msk.f32.vlgmr.msra.gmra.mrb[16].mxu0 %vm180_vm1, %v2464_v30 }
 0x838   : > { %2351 = vmatpush3.bf16.msra.mxu0 %v2790_v11  ;;  %2200 = vmatprep.mubr.msk.f32.mxu0 %vm2580_vm2, %v2581_v14 }
 0x839   : > { %2352 = vmatprep.subr.bf16.mxu0 %v2579_v5 }
 0x83c   : > { %2354 = vmatpush3.bf16.msra.mxu0 %v2794_v16 }
 0x83d   : > { %2361 = vmatprep.subr.bf16.mxu0 %v2579_v5 }
 0x90a   : > { %v1147_v31 = vpop.f32.mrb[16].mxu0 }
 0x90b   : > { %v1152_v32 = vrot.slane %v1147_v31, 7  ;;  %v2180_v33 = vpop.f32.mrb[17].mxu0 }
 0x90d   : > { %v1154_v34 = vadd.f32 %v1152_v32, %v2819_v27 }
 0x90f   : > { %2465 = vtanh.f32 %v1154_v34 }
 0x919   : > { %v2466_v35 = vpop.eup %2465 }
 0x91a   : > { %1157 = vst.msk [vmem:[#allocation3] sm:$0x2] %vm1156_vm4, %v2466_v35  ;;  %v1159_v36 = vrot.slane %v2466_v35, 1 }
 0x91c   : > { %2190 = vmatmul.mubr.msk.f32.vlgmr.msra.gmra.mrb[12].mxu1 %vm180_vm1, %v1159_v36 }
 0x91d   : > { %2357 = vmatpush3.bf16.msra.mxu1 %v2790_v11  ;;  %2211 = vmatprep.mubr.msk.f32.mxu1 %vm2580_vm2, %v2581_v14 }
 0x91e   : > { %2358 = vmatprep.subr.bf16.mxu1 %v2579_v5 }
 0x921   : > { %2360 = vmatpush3.bf16.msra.mxu1 %v2794_v16 }
 0x922   : > { %2367 = vmatprep.subr.bf16.mxu1 %v2579_v5 }
 0x9ef   : > { %v1228_v37 = vpop.f32.mrb[12].mxu1 }
 0x9f0   : > { %v1233_v38 = vrot.slane %v1228_v37, 6  ;;  %v2191_v39 = vpop.f32.mrb[13].mxu1 }
 0x9f2   : > { %v1235_v40 = vadd.f32 %v1233_v38, %v2819_v27 }
 0x9f4   : > { %2467 = vtanh.f32 %v1235_v40 }
 0x9fe   : > { %v2468_v41 = vpop.eup %2467 }
 0x9ff   : > { %1238 = vst.msk [vmem:[#allocation3] sm:$0x4] %vm1237_vm5, %v2468_v41  ;;  %v1240_v42 = vrot.slane %v2468_v41, 2 }
 0xa01   : > { %2201 = vmatmul.mubr.msk.f32.vlgmr.msra.gmra.mrb[18].mxu0 %vm180_vm1, %v1240_v42 }
 0xa02   : > { %2363 = vmatpush3.bf16.msra.mxu0 %v2790_v11  ;;  %2222 = vmatprep.mubr.msk.f32.mxu0 %vm2580_vm2, %v2581_v14 }
 0xa03   : > { %2364 = vmatprep.subr.bf16.mxu0 %v2579_v5 }
 0xa06   : > { %2366 = vmatpush3.bf16.msra.mxu0 %v2794_v16 }
 0xa07   : > { %2373 = vmatprep.subr.bf16.mxu0 %v2579_v5 }
 0xad4   : > { %v1309_v43 = vpop.f32.mrb[18].mxu0 }
 0xad5   : > { %v1314_v44 = vrot.slane %v1309_v43, 5  ;;  %v2202_v45 = vpop.f32.mrb[19].mxu0 }
 0xad7   : > { %v1316_v46 = vadd.f32 %v1314_v44, %v2819_v27 }
 0xad9   : > { %2469 = vtanh.f32 %v1316_v46 }
 0xae3   : > { %v2470_v47 = vpop.eup %2469 }
 0xae4   : > { %1319 = vst.msk [vmem:[#allocation3] sm:$0x8] %vm1318_vm6, %v2470_v47  ;;  %v1321_v48 = vrot.slane %v2470_v47, 3 }
 0xae6   : > { %2212 = vmatmul.mubr.msk.f32.vlgmr.msra.gmra.mrb[14].mxu1 %vm180_vm1, %v1321_v48 }
 0xae7   : > { %2369 = vmatpush3.bf16.msra.mxu1 %v2790_v11  ;;  %2233 = vmatprep.mubr.msk.f32.mxu1 %vm2580_vm2, %v2581_v14 }
 0xae8   : > { %2370 = vmatprep.subr.bf16.mxu1 %v2579_v5 }
 0xaeb   : > { %2372 = vmatpush3.bf16.msra.mxu1 %v2794_v16 }
 0xaec   : > { %2379 = vmatprep.subr.bf16.mxu1 %v2579_v5 }
 0xbb9   : > { %v1390_v49 = vpop.f32.mrb[14].mxu1 }
 0xbba   : > { %v1395_v50 = vrot.slane %v1390_v49, 4  ;;  %v2213_v51 = vpop.f32.mrb[15].mxu1 }
 0xbbc   : > { %v1397_v52 = vadd.f32 %v1395_v50, %v2819_v27 }
 0xbbe   : > { %2471 = vtanh.f32 %v1397_v52 }
 0xbc8   : > { %v2472_v53 = vpop.eup %2471 }
 0xbc9   : > { %1400 = vst.msk [vmem:[#allocation3] sm:$0x10] %vm1399_vm7, %v2472_v53  ;;  %v1402_v54 = vrot.slane %v2472_v53, 4 }
 0xbcb   : > { %2223 = vmatmul.mubr.msk.f32.vlgmr.msra.gmra.mrb[20].mxu0 %vm180_vm1, %v1402_v54 }
 0xbcc   : > { %2375 = vmatpush3.bf16.msra.mxu0 %v2790_v11  ;;  %2244 = vmatprep.mubr.msk.f32.mxu0 %vm2580_vm2, %v2581_v14 }
 0xbcd   : > { %2376 = vmatprep.subr.bf16.mxu0 %v2579_v5 }
 0xbd0   : > { %2378 = vmatpush3.bf16.msra.mxu0 %v2794_v16  ;;  %v1648_v16 = vld [vmem:[#allocation4 + $0xa0] sm:$0xff] }
 0xbd1   : > { %2385 = vmatprep.subr.bf16.mxu0 %v2579_v5  ;;  %v2389_v19 = vpack.c.bf16 %v1649_v17, %v1648_v16 }
 0xc9e   : > { %v1471_v55 = vpop.f32.mrb[20].mxu0 }
 0xc9f   : > { %v1476_v56 = vrot.slane %v1471_v55, 3  ;;  %v2224_v57 = vpop.f32.mrb[21].mxu0 }
 0xca1   : > { %v1478_v58 = vadd.f32 %v1476_v56, %v2819_v27 }
 0xca3   : > { %2473 = vtanh.f32 %v1478_v58 }
 0xcad   : > { %v2474_v61 = vpop.eup %2473 }
 0xcae   : > { %1481 = vst.msk [vmem:[#allocation3] sm:$0x20] %vm1480_vm8, %v2474_v61  ;;  %v1483_v63 = vrot.slane %v2474_v61, 5 }
 0xcb0   : > { %2234 = vmatmul.mubr.msk.f32.vlgmr.msra.gmra.mrb[16].mxu1 %vm180_vm1, %v1483_v63 }
 0xcb1   : > { %2381 = vmatpush3.bf16.msra.mxu1 %v2380_v62  ;;  %2255 = vmatprep.mubr.msk.f32.mxu1 %vm2580_vm2, %v2581_v14 }
 0xcb2   : > { %2382 = vmatprep.subr.bf16.mxu1 %v2579_v5 }
 0xcb5   : > { %2384 = vmatpush3.bf16.msra.mxu1 %v2383_v2 }
 0xcb8   : > { %2256 = vmatmul.mubr.msk.f32.vlgmr.msra.gmra.mrb[18].mxu1 %vm180_vm1, %v2809_v23 }
 0xd83   : > { %v1552_v3 = vpop.f32.mrb[16].mxu1 }
 0xd84   : > { %v1557_v4 = vrot.slane %v1552_v3, 2  ;;  %v2235_v6 = vpop.f32.mrb[17].mxu1 }
 0xd86   : > { %v1559_v7 = vadd.f32 %v1557_v4, %v2819_v27 }
 0xd88   : > { %2475 = vtanh.f32 %v1559_v7 }
 0xd8b   : > { %v1720_v8 = vpop.f32.mrb[18].mxu1 }
 0xd8c   : > { %v2257_v9 = vpop.f32.mrb[19].mxu1 }
 0xd92   : > { %v2476_v10 = vpop.eup %2475 }
 0xd93   : > { %1562 = vst.msk [vmem:[#allocation3] sm:$0x40] %vm1561_vm9, %v2476_v10  ;;  %v1564_v11 = vrot.slane %v2476_v10, 6 }
 0xd95   : > { %2245 = vmatmul.mubr.msk.f32.vlgmr.msra.gmra.mrb[22].mxu0 %vm180_vm1, %v1564_v11 }
 0xd96   : > { %2266 = vmatprep.mubr.msk.f32.mxu0 %vm2580_vm2, %v2581_v14  ;;  %2387 = vmatpush3.bf16.msra.mxu0 %v2386_v15 }
 0xd97   : > { %2388 = vmatprep.subr.bf16.mxu0 %v2579_v5  ;;  %v1927_v5 = vld [vmem:[#allocation4 + $0xd0] ss:$0 sm:$0xff] }
 0xd9a   : > { %2390 = vmatpush3.bf16.msra.mxu0 %v2389_v19 }
 0xe68   : > { %v1633_v20 = vpop.f32.mrb[22].mxu0 }
 0xe69   : > { %v1638_v21 = vrot.slane %v1633_v20, 1  ;;  %v2246_v22 = vpop.f32.mrb[23].mxu0 }
 0xe6b   : > { %v1640_v23 = vadd.f32 %v1638_v21, %v2819_v27 }
 0xe6d   : > { %2477 = vtanh.f32 %v1640_v23 }
 0xe77   : > { %v2478_v14 = vpop.eup %2477 }
 0xe78   : > { %1643 = vst.msk [vmem:[#allocation3] sm:$0x80] %vm1642_vm10, %v2478_v14  ;;  %1644 = vst.msk [vmem:[#allocation2 - $0x7] sm:$0x80] %vm1642_vm10, %v2478_v14 }
 0xe7f   : > { %v1645_v18 = vld [vmem:[#allocation3] sm:$0xff] }
 0xe80   : > { %2267 = vmatmul.mubr.msk.f32.vlgmr.msra.gmra.mrb[24].mxu0 %vm180_vm1, %v1645_v18 }
 0xf53   : > { %v1793_v24 = vpop.f32.mrb[24].mxu0 }
 0xf54   : > { %v1794_v25 = vadd.f32 %v1793_v24, %v1720_v8  ;;  %v2268_v26 = vpop.f32.mrb[25].mxu0 }
 0xf56   : > { %v1802_v28 = vadd.f32 %v1927_v5, %v1794_v25 }
 0xf58   : > { %1803 = vst [vmem:[%s151_s25] sm:$0xff] %v1802_v28 }
 0xf59   : > { %2520 = shalt.err (!%p2517_p8)
}
 0xf5a   : > { %s2521_s7 = scalar_lea.hbm %s2881_s30, 128  ;;  %s2525_s16 = scalar_lea.hbm %s2929_s2, 256 }
 0xf5b   : > { %p2522_p12 = scmp.ne.s32.totalorder %s2881_s30, %s2521_s7  ;;  %p2526_p1 = scmp.lt.u32.totalorder %s2881_s30, %s2929_s2 }
 0xf5c   : > { %p2527_p5 = scmp.lt.u32.totalorder %s2525_s16, %s2521_s7  ;;  %p2529_p9 = scmp.lt.u32.totalorder %s2521_s7, %s2881_s30 }
 0xf5d   : > { %p2523_p0 = pnand %p2522_p12, %p2941_p10 }
 0xf5e   : > { %p2528_p6 = por %p2527_p5, %p2526_p1 }
 0xf5f   : > { %p2524_p2 = pneg %p2523_p0 }
 0xf60   : > { %p2530_p11 = por %p2529_p9, %p2528_p6 }
 0xf62   : > { %p2531_p13 = pnand %p2530_p11, %p2524_p2 }
 0xf64   : > { %2534 = shalt.err (!%p2531_p13)
}
 0xf65   : > { %2395 = dma.vmem_to_hbm [thread:$0]  (%p2941_p10), %s2883_s27, 128, %s2881_s30, %s1805_s3  }
 0xf66 PF: > { %p2407_p3 = scmp.ge.s32.totalorder %s2573_s12, 2  ;;  %s1830_s21 = sand.u32 1, %s2561_s9  }
 0xf67   : > { %p2942_p4 = scmp.ne.s32.totalorder %s2934_s20, 0  ;;  %s1831_s23 = scalar_lea.sflag [#allocation6], %s1830_s21 }
 0xf69   : > { %p2402_p7 = pnand %p2407_p3, %p2942_p4 }
 0xf6b   : > { %2556 = dma.done.wait (!%p2402_p7), %s1831_s23, 128  }
 0xf6c   : > { %2558 = vsyncadd (!%p2402_p7), %s1831_s23, 4294967168  ;;  %p13_p8 = scmp.ge.s32.totalorder %s2623_s15, 4   ;;  %s2943_s9 = smov %s2565_s10 }
 0xf6d   : > { %s2944_s10 = smov %s2569_s11  ;;  %s2945_s11 = smov %s2634_s18 }
 0xf6e   : > { %s2946_s12 = smov %s2623_s15  ;;  %15 = sbr.rel (!%p13_p8) target bundleno = 4 (0x4), region = 72 }
 0xf75   :  { %1836 = vsyncpa [#allocation5], 1 }
 0xf76   :  { %1838 = vsyncpa [#allocation5 + $0x1], 1 }
 0xf77   :  { %1839 = vsyncpa [#allocation6], 1 }
 0xf78   :  { %1841 = vsyncpa [#allocation6 + $0x1], 1 }

</bundles_post_ra>
